<compile_context>
chip_gen: v7x
topology: tpu7x:2x2x1
jax: 0.10.0
libtpu: 0.0.40
codegen_flags: <defaults>
</compile_context>

<pallas_src>
import functools

import jax
import jax.numpy as jnp
from jax.experimental import pallas as pl
from jax.experimental.pallas import tpu as pltpu


def _round_up(x: int, m: int) -> int:
    return ((x + m - 1) // m) * m


def _cdiv(a: int, b: int) -> int:
    return -(-a // b)


def _cvx_kernel(x_ref, w_ref, b_ref, sv_ref, o_ref, acc_ref, *,
                compute_dtype, abs_act: bool, lane_dense_out: bool):
    j = pl.program_id(1)

    @pl.when(j == 0)
    def _init():
        acc_ref[...] = jnp.zeros_like(acc_ref)

    # Fused two-branch matmul.  X is cast to the MXU dtype here (in VMEM), so
    # the HBM stream stays in the caller's dtype and is never copied/padded.
    x = x_ref[...].astype(compute_dtype)
    s = jnp.dot(x, w_ref[...], preferred_element_type=jnp.float32)
    s = s + b_ref[...]                               # folded bias, kept in f32

    a = jnp.abs(s) if abs_act else jnp.maximum(s, 0.0)

    # Signed reduction over hidden units as a second (K x 1) MXU matmul:
    # sv is +1 on branch-1 lanes, -1 on branch-2 lanes, 0 on padding lanes.
    acc_ref[...] += jnp.dot(a, sv_ref[...], preferred_element_type=jnp.float32)

    @pl.when(j == pl.num_programs(1) - 1)
    def _store():
        if lane_dense_out:
            # (tile, 1) column -> (1, tile) lane-dense row -> (1, 1, tile) block.
            row = jnp.transpose(acc_ref[...], (1, 0))
            o_ref[...] = row.reshape(o_ref.shape).astype(o_ref.dtype)
        else:
            o_ref[...] = acc_ref[...].astype(o_ref.dtype)


def make_cvx_model(u1, u2, mean=0.0, std=1.0, abs_act=False, *,
                   matmul_dtype=jnp.bfloat16, tile_n=512, m_tile=512,
                   vmem_budget_bytes=None):
    """Build CvxModel.forward as a Pallas TPU kernel; returns forward(x).

    The weight slab, folded bias and signed-reduce vector are built once here
    (hoisted out of the per-call path).  matmul_dtype defaults to bfloat16 on
    all TPU generations (v5e/v6e/v7x MXUs are bf16-native); accumulation and
    the folded bias stay in float32.
    """
    u1 = jnp.asarray(u1, jnp.float32)
    u2 = jnp.asarray(u2, jnp.float32)
    if u1.ndim != 2 or u1.shape != u2.shape:
        raise ValueError("u1 and u2 must both have shape (D+1, M)")
    D = u1.shape[0] - 1
    M = u1.shape[1]

    std_arr = jnp.asarray(std, jnp.float32)
    if std_arr.size != 1:
        # The torch module's trailing `* std` is only well defined for scalars.
        raise ValueError("cvx_model: only scalar std is supported")
    std_f = std_arr.reshape(())
    try:
        if float(std_arr) <= 0.0:
            raise ValueError("cvx_model: std must be > 0 (bias folding relies "
                             "on positive homogeneity of relu/abs)")
    except TypeError:
        pass  # traced std: caller must guarantee std > 0
    mean_vec = jnp.broadcast_to(jnp.asarray(mean, jnp.float32), (D,))

    cdt = jnp.dtype(matmul_dtype)
    w_isz = cdt.itemsize

    w1, b1 = u1[:-1], u1[-1]
    w2, b2 = u2[:-1], u2[-1]
    # Fold normalization + trailing *std into the biases (f32):
    #   act(((x-mean)/std) @ W + b) * std == act(x @ W + (b*std - mean @ W))
    b1f = b1 * std_f - mean_vec @ w1
    b2f = b2 * std_f - mean_vec @ w2

    m_pad = _round_up(M, 128)
    k2 = 2 * m_pad

    # ---- generation-aware VMEM budget --------------------------------------
    try:
        vmem_cap = int(pltpu.get_tpu_info().vmem_capacity_bytes)
    except Exception:
        vmem_cap = 64 * 2 ** 20            # conservative (v7x-sized) fallback
    vmem_limit = max(32 * 2 ** 20, int(0.8 * vmem_cap))
    budget = (vmem_budget_bytes if vmem_budget_bytes is not None
              else int(0.6 * vmem_cap))

    def vmem_est(tile, mt, n_j, x_isz=4):
        wbuf = D * mt * w_isz * (1 if n_j == 1 else 2)      # weight block(s)
        xbuf = 2 * tile * D * x_isz                         # double-buffered X
        small = 4 * mt * 4 + 3 * tile * 4                   # bias, sv, out, acc
        interm = 2 * tile * mt * 4                          # f32 scores + act
        return wbuf + xbuf + small + interm

    # Row tile (planning value; shrunk for small batches at call time).
    tile_plan = max(128, _round_up(int(tile_n), 128))

    # Hidden-unit tiling: keep the whole fused slab resident if it fits the
    # budget, otherwise tile it along a trailing "arbitrary" reduction axis.
    if vmem_est(tile_plan, k2, 1) <= budget:
        mt = k2
    else:
        mt = min(max(256, _round_up(int(m_tile), 256)), k2)
    k2_pad = _round_up(k2, mt)
    n_j = k2_pad // mt

    # ---- fused weight slab / folded bias / signed reduce vector ------------
    w_aug = jnp.zeros((D, k2_pad), jnp.float32)
    w_aug = w_aug.at[:, :M].set(w1).at[:, m_pad:m_pad + M].set(w2)
    w_aug = w_aug.astype(cdt)
    bias = jnp.zeros((1, k2_pad), jnp.float32)
    bias = bias.at[0, :M].set(b1f).at[0, m_pad:m_pad + M].set(b2f)
    sv = jnp.zeros((k2_pad, 1), jnp.float32)
    sv = sv.at[:M, 0].set(1.0).at[m_pad:m_pad + M, 0].set(-1.0)

    def forward(x):
        if x.ndim != 2 or x.shape[1] != D:
            raise ValueError(f"x must have shape (N, {D})")
        N = x.shape[0]
        x_isz = jnp.dtype(x.dtype).itemsize

        if N <= tile_plan:
            tile = max(8, _round_up(N, 8))
        else:
            tile = tile_plan
        while vmem_est(tile, mt, n_j, x_isz) > budget and tile > 128:
            tile //= 2                      # stays a multiple of 128
        n_i = _cdiv(N, tile)
        grid = (n_i, n_j)

        cost = pl.CostEstimate(
            flops=2 * n_i * tile * D * k2_pad + 3 * n_i * tile * k2_pad,
            transcendentals=0,
            bytes_accessed=(N * D * x_isz
                            + D * k2_pad * w_isz * (1 if n_j == 1 else n_i)
                            + 8 * k2_pad + 4 * n_i * tile),
        )
        cparams = pltpu.CompilerParams(
            dimension_semantics=("parallel", "arbitrary"),
            vmem_limit_bytes=vmem_limit)

        def run(single_buffer_w, lane_dense):
            if single_buffer_w and hasattr(pl, "Buffered"):
                # Constant-index weight block: one buffer is enough (saves
                # a full weight slab of VMEM, important on v7x).
                w_spec = pl.BlockSpec((D, mt), lambda i, j: (0, j),
                                      pipeline_mode=pl.Buffered(1))
            else:
                w_spec = pl.BlockSpec((D, mt), lambda i, j: (0, j))
            if lane_dense:
                out_shape = jax.ShapeDtypeStruct((n_i, 1, tile), jnp.float32)
                out_spec = pl.BlockSpec((1, 1, tile), lambda i, j: (i, 0, 0))
            else:
                out_shape = jax.ShapeDtypeStruct((n_i * tile, 1), jnp.float32)
                out_spec = pl.BlockSpec((tile, 1), lambda i, j: (i, 0))

            kernel = functools.partial(_cvx_kernel, compute_dtype=cdt,
                                       abs_act=abs_act,
                                       lane_dense_out=lane_dense)
            out = pl.pallas_call(
                kernel,
                out_shape=out_shape,
                grid=grid,
                in_specs=[
                    pl.BlockSpec((tile, D), lambda i, j: (i, 0)),  # X, unpadded
                    w_spec,                                        # fused weights
                    pl.BlockSpec((1, mt), lambda i, j: (0, j)),    # folded bias
                    pl.BlockSpec((mt, 1), lambda i, j: (j, 0)),    # signed vector
                ],
                out_specs=out_spec,
                scratch_shapes=[pltpu.VMEM((tile, 1), jnp.float32)],
                compiler_params=cparams,
                cost_estimate=cost,
            )(x, w_aug, bias, sv)
            return out.reshape(n_i * tile, 1)[:N]

        # Preferred config first; fall back (in eager mode) if an optional
        # feature (single-buffered weights / lane-dense store) fails to lower
        # on this jax / libtpu version.
        attempts = [(n_j == 1, True)]
        if n_j == 1:
            attempts.append((False, True))
        attempts.append((False, False))
        err = None
        for sb, ld in attempts:
            try:
                return run(sb, ld)
            except Exception as e:   # noqa: BLE001 - deliberate feature fallback
                err = e
        raise err

    return forward


def cvx_model_forward(x, u1, u2, mean=0.0, std=1.0, abs_act=False, **kwargs):
    """One-shot convenience wrapper (prefer make_cvx_model for repeated calls)."""
    return make_cvx_model(u1, u2, mean=mean, std=std, abs_act=abs_act, **kwargs)(x)


def cvx_model_ref(x, u1, u2, mean=0.0, std=1.0, abs_act=False):
    """Pure-JAX reference mirroring the PyTorch `net` + CvxModel.forward."""
    xn = (x - mean) / std
    sc1 = xn @ u1[:-1] + u1[-1]
    sc2 = xn @ u2[:-1] + u2[-1]
    if abs_act:
        id1, id2 = jnp.sign(sc1), jnp.sign(sc2)
    else:
        id1 = (sc1 > 0).astype(sc1.dtype)
        id2 = (sc2 > 0).astype(sc2.dtype)
    out = (id1 * sc1).sum(1, keepdims=True) - (id2 * sc2).sum(1, keepdims=True)
    return out * std


if __name__ == "__main__":
    key = jax.random.PRNGKey(0)
    ka, kb, kc, kd, ke = jax.random.split(key, 5)

    D, M = 16, 32
    mean, std = 0.5, 2.0
    u1 = jax.random.normal(ka, (D + 1, M), jnp.float32) * 0.1
    u2 = jax.random.normal(kb, (D + 1, M), jnp.float32) * 0.1

    # 1) relu path, small batch, explicit f32 MXU path: tight check.
    x = jax.random.normal(kc, (8, D), jnp.float32)
    model_f32 = make_cvx_model(u1, u2, mean=mean, std=std, abs_act=False,
                               matmul_dtype=jnp.float32)
    out = jax.block_until_ready(model_f32(x))
    ref = cvx_model_ref(x, u1, u2, mean=mean, std=std, abs_act=False)
    assert out.shape == (8, 1)
    assert jnp.allclose(out, ref, atol=1e-3, rtol=1e-3)

    # 2) abs path, non-divisible batch (ragged last row tile), f32.
    x2 = jax.random.normal(kd, (50, D), jnp.float32)
    model_abs = make_cvx_model(u1, u2, mean=mean, std=std, abs_act=True,
                               matmul_dtype=jnp.float32)
    out2 = jax.block_until_ready(model_abs(x2))
    ref2 = cvx_model_ref(x2, u1, u2, mean=mean, std=std, abs_act=True)
    assert out2.shape == (50, 1)
    assert jnp.allclose(out2, ref2, atol=1e-3, rtol=1e-3)

    # 3) default bf16 MXU path (all generations), f32 accumulation: loose check.
    model_bf16 = make_cvx_model(u1, u2, mean=mean, std=std, abs_act=False)
    out3 = jax.block_until_ready(model_bf16(x2))
    ref3 = cvx_model_ref(x2, u1, u2, mean=mean, std=std, abs_act=False)
    assert out3.shape == (50, 1)
    assert jnp.allclose(out3, ref3, atol=2e-1, rtol=1e-1)

    # 4) forced hidden-unit (M) tiling: multi-step reduction + accumulator.
    M2 = 300
    u1b = jax.random.normal(ke, (D + 1, M2), jnp.float32) * 0.05
    u2b = jax.random.normal(ka, (D + 1, M2), jnp.float32) * 0.05
    x3 = jax.random.normal(kc, (40, D), jnp.float32)
    model_tiled = make_cvx_model(u1b, u2b, mean=mean, std=std, abs_act=False,
                                 matmul_dtype=jnp.float32, m_tile=256,
                                 vmem_budget_bytes=200_000)
    out4 = jax.block_until_ready(model_tiled(x3))
    ref4 = cvx_model_ref(x3, u1b, u2b, mean=mean, std=std, abs_act=False)
    assert out4.shape == (40, 1)
    assert jnp.allclose(out4, ref4, atol=1e-3, rtol=1e-3)

    print("KERNEL_OK")
</pallas_src>

<mosaic_0001>
module attributes {stable_mosaic.version = 11 : i64} {
  func.func @_cvx_kernel(%arg0: i32, %arg1: i32, %arg2: memref<8x16xf32, #tpu.memory_space<vmem>>, %arg3: memref<16x256xf32, #tpu.memory_space<vmem>>, %arg4: memref<1x256xf32, #tpu.memory_space<vmem>>, %arg5: memref<256x1xf32, #tpu.memory_space<vmem>>, %arg6: memref<1x1x8xf32, #tpu.memory_space<vmem>>, %arg7: memref<8x1xf32, #tpu.memory_space<vmem>>) attributes {dimension_semantics = [#tpu.dimension_semantics<parallel>, #tpu.dimension_semantics<arbitrary>], iteration_bounds = array<i64: 1, 1>, scalar_prefetch = 0 : i64, scratch_operands = 1 : i64, tpu.core_type = #tpu.core_type<tc>, window_params = [{transform_indices = @transform_0, window_bounds = array<i64: 8, 16>}, {pipeline_mode = #tpu.pipeline_mode<synchronous>, transform_indices = @transform_1, window_bounds = array<i64: 16, 256>}, {transform_indices = @transform_2, window_bounds = array<i64: 1, 256>}, {transform_indices = @transform_3, window_bounds = array<i64: 256, 1>}, {transform_indices = @transform_4, window_bounds = array<i64: 1, 1, 8>}]} {
    %c0_i32 = arith.constant 0 : i32
    %0 = arith.cmpi eq, %arg1, %c0_i32 : i32
    %1 = arith.extui %0 : i1 to i32
    %c0_i32_0 = arith.constant 0 : i32
    %2 = arith.cmpi ne, %1, %c0_i32_0 : i32
    scf.if %2 {
      %cst_16 = arith.constant 0.000000e+00 : f32
      %19 = vector.broadcast %cst_16 : f32 to vector<8x1xf32>
      %c0_17 = arith.constant 0 : index
      %c0_18 = arith.constant 0 : index
      %20 = vector.load %arg7[%c0_17, %c0_18] : memref<8x1xf32, #tpu.memory_space<vmem>>, vector<8x1xf32>
      tpu.vector_store %arg7[%c0_17, %c0_18], %19 {strides = array<i32>} : memref<8x1xf32, #tpu.memory_space<vmem>>, vector<8x1xf32>,
    } else {
    }
    %c0 = arith.constant 0 : index
    %c0_1 = arith.constant 0 : index
    %3 = vector.load %arg2[%c0, %c0_1] : memref<8x16xf32, #tpu.memory_space<vmem>>, vector<8x16xf32>
    %c0_2 = arith.constant 0 : index
    %c0_3 = arith.constant 0 : index
    %4 = vector.load %arg3[%c0_2, %c0_3] : memref<16x256xf32, #tpu.memory_space<vmem>>, vector<16x256xf32>
    %cst = arith.constant dense<0.000000e+00> : vector<8x256xf32>
    %5 = tpu.matmul %3, %4, %cst {dimension_numbers = #tpu.dot_dimension_numbers<[1], [0], [0], [1], [0, 0, 1, 1], [], []>} : vector<8x16xf32>, vector<16x256xf32>, vector<8x256xf32> -> vector<8x256xf32>
    %c0_4 = arith.constant 0 : index
    %c0_5 = arith.constant 0 : index
    %6 = vector.load %arg4[%c0_4, %c0_5] : memref<1x256xf32, #tpu.memory_space<vmem>>, vector<1x256xf32>
    %7 = vector.broadcast %6 : vector<1x256xf32> to vector<8x256xf32>
    %8 = arith.addf %5, %7 : vector<8x256xf32>
    %cst_6 = arith.constant 0.000000e+00 : f32
    %9 = vector.broadcast %cst_6 : f32 to vector<8x256xf32>
    %10 = arith.maximumf %8, %9 : vector<8x256xf32>
    %c0_7 = arith.constant 0 : index
    %c0_8 = arith.constant 0 : index
    %11 = vector.load %arg7[%c0_7, %c0_8] : memref<8x1xf32, #tpu.memory_space<vmem>>, vector<8x1xf32>
    %c0_9 = arith.constant 0 : index
    %c0_10 = arith.constant 0 : index
    %12 = vector.load %arg5[%c0_9, %c0_10] : memref<256x1xf32, #tpu.memory_space<vmem>>, vector<256x1xf32>
    %cst_11 = arith.constant dense<0.000000e+00> : vector<8x1xf32>
    %13 = tpu.matmul %10, %12, %cst_11 {dimension_numbers = #tpu.dot_dimension_numbers<[1], [0], [0], [1], [0, 0, 1, 1], [], []>} : vector<8x256xf32>, vector<256x1xf32>, vector<8x1xf32> -> vector<8x1xf32>
    %14 = arith.addf %11, %13 : vector<8x1xf32>
    %c0_12 = arith.constant 0 : index
    %c0_13 = arith.constant 0 : index
    %15 = vector.load %arg7[%c0_12, %c0_13] : memref<8x1xf32, #tpu.memory_space<vmem>>, vector<8x1xf32>
    tpu.vector_store %arg7[%c0_12, %c0_13], %14 {strides = array<i32>} : memref<8x1xf32, #tpu.memory_space<vmem>>, vector<8x1xf32>,
    %c0_i32_14 = arith.constant 0 : i32
    %16 = arith.cmpi eq, %arg1, %c0_i32_14 : i32
    %17 = arith.extui %16 : i1 to i32
    %c0_i32_15 = arith.constant 0 : i32
    %18 = arith.cmpi ne, %17, %c0_i32_15 : i32
    scf.if %18 {
      %c0_16 = arith.constant 0 : index
      %c0_17 = arith.constant 0 : index
      %19 = vector.load %arg7[%c0_16, %c0_17] : memref<8x1xf32, #tpu.memory_space<vmem>>, vector<8x1xf32>
      %20 = tpu.transpose %19, [1, 0] : vector<8x1xf32> -> vector<1x8xf32>
      %21 = vector.shape_cast %20 : vector<1x8xf32> to vector<1x1x8xf32>
      %c0_18 = arith.constant 0 : index
      %c0_19 = arith.constant 0 : index
      %c0_20 = arith.constant 0 : index
      %22 = vector.load %arg6[%c0_18, %c0_19, %c0_20] : memref<1x1x8xf32, #tpu.memory_space<vmem>>, vector<1x1x8xf32>
      tpu.vector_store %arg6[%c0_18, %c0_19, %c0_20], %21 {strides = array<i32>} : memref<1x1x8xf32, #tpu.memory_space<vmem>>, vector<1x1x8xf32>,
    } else {
    }
    return
  }
  func.func @transform_0(%arg0: i32, %arg1: i32) -> (i32, i32) {
    %c0_i32 = arith.constant 0 : i32
    %c0_i32_0 = arith.constant 0 : i32
    return %arg0, %c0_i32 : i32, i32
  }
  func.func @transform_1(%arg0: i32, %arg1: i32) -> (i32, i32) {
    %c0_i32 = arith.constant 0 : i32
    %c0_i32_0 = arith.constant 0 : i32
    return %c0_i32, %arg1 : i32, i32
  }
  func.func @transform_2(%arg0: i32, %arg1: i32) -> (i32, i32) {
    %c0_i32 = arith.constant 0 : i32
    %c0_i32_0 = arith.constant 0 : i32
    return %c0_i32, %arg1 : i32, i32
  }
  func.func @transform_3(%arg0: i32, %arg1: i32) -> (i32, i32) {
    %c0_i32 = arith.constant 0 : i32
    %c0_i32_0 = arith.constant 0 : i32
    return %arg1, %c0_i32 : i32, i32
  }
  func.func @transform_4(%arg0: i32, %arg1: i32) -> (i32, i32, i32) {
    %c0_i32 = arith.constant 0 : i32
    %c0_i32_0 = arith.constant 0 : i32
    %c0_i32_1 = arith.constant 0 : i32
    return %arg0, %c0_i32, %c0_i32_0 : i32, i32, i32
  }
}

module attributes {stable_mosaic.version = 11 : i64} {
  func.func @_cvx_kernel(%arg0: i32, %arg1: i32, %arg2: memref<8x16xf32, #tpu.memory_space<vmem>>, %arg3: memref<16x256xf32, #tpu.memory_space<vmem>>, %arg4: memref<1x256xf32, #tpu.memory_space<vmem>>, %arg5: memref<256x1xf32, #tpu.memory_space<vmem>>, %arg6: memref<1x1x8xf32, #tpu.memory_space<vmem>>, %arg7: memref<8x1xf32, #tpu.memory_space<vmem>>) attributes {dimension_semantics = [#tpu.dimension_semantics<parallel>, #tpu.dimension_semantics<arbitrary>], iteration_bounds = array<i64: 1, 1>, scalar_prefetch = 0 : i64, scratch_operands = 1 : i64, tpu.core_type = #tpu.core_type<tc>, window_params = [{transform_indices = @transform_0, window_bounds = array<i64: 8, 16>}, {transform_indices = @transform_1, window_bounds = array<i64: 16, 256>}, {transform_indices = @transform_2, window_bounds = array<i64: 1, 256>}, {transform_indices = @transform_3, window_bounds = array<i64: 256, 1>}, {transform_indices = @transform_4, window_bounds = array<i64: 1, 1, 8>}]} {
    %c0_i32 = arith.constant 0 : i32
    %0 = arith.cmpi eq, %arg1, %c0_i32 : i32
    %1 = arith.extui %0 : i1 to i32
    %c0_i32_0 = arith.constant 0 : i32
    %2 = arith.cmpi ne, %1, %c0_i32_0 : i32
    scf.if %2 {
      %cst_16 = arith.constant 0.000000e+00 : f32
      %19 = vector.broadcast %cst_16 : f32 to vector<8x1xf32>
      %c0_17 = arith.constant 0 : index
      %c0_18 = arith.constant 0 : index
      %20 = vector.load %arg7[%c0_17, %c0_18] : memref<8x1xf32, #tpu.memory_space<vmem>>, vector<8x1xf32>
      tpu.vector_store %arg7[%c0_17, %c0_18], %19 {strides = array<i32>} : memref<8x1xf32, #tpu.memory_space<vmem>>, vector<8x1xf32>,
    } else {
    }
    %c0 = arith.constant 0 : index
    %c0_1 = arith.constant 0 : index
    %3 = vector.load %arg2[%c0, %c0_1] : memref<8x16xf32, #tpu.memory_space<vmem>>, vector<8x16xf32>
    %c0_2 = arith.constant 0 : index
    %c0_3 = arith.constant 0 : index
    %4 = vector.load %arg3[%c0_2, %c0_3] : memref<16x256xf32, #tpu.memory_space<vmem>>, vector<16x256xf32>
    %cst = arith.constant dense<0.000000e+00> : vector<8x256xf32>
    %5 = tpu.matmul %3, %4, %cst {dimension_numbers = #tpu.dot_dimension_numbers<[1], [0], [0], [1], [0, 0, 1, 1], [], []>} : vector<8x16xf32>, vector<16x256xf32>, vector<8x256xf32> -> vector<8x256xf32>
    %c0_4 = arith.constant 0 : index
    %c0_5 = arith.constant 0 : index
    %6 = vector.load %arg4[%c0_4, %c0_5] : memref<1x256xf32, #tpu.memory_space<vmem>>, vector<1x256xf32>
    %7 = vector.broadcast %6 : vector<1x256xf32> to vector<8x256xf32>
    %8 = arith.addf %5, %7 : vector<8x256xf32>
    %cst_6 = arith.constant 0.000000e+00 : f32
    %9 = vector.broadcast %cst_6 : f32 to vector<8x256xf32>
    %10 = arith.maximumf %8, %9 : vector<8x256xf32>
    %c0_7 = arith.constant 0 : index
    %c0_8 = arith.constant 0 : index
    %11 = vector.load %arg7[%c0_7, %c0_8] : memref<8x1xf32, #tpu.memory_space<vmem>>, vector<8x1xf32>
    %c0_9 = arith.constant 0 : index
    %c0_10 = arith.constant 0 : index
    %12 = vector.load %arg5[%c0_9, %c0_10] : memref<256x1xf32, #tpu.memory_space<vmem>>, vector<256x1xf32>
    %cst_11 = arith.constant dense<0.000000e+00> : vector<8x1xf32>
    %13 = tpu.matmul %10, %12, %cst_11 {dimension_numbers = #tpu.dot_dimension_numbers<[1], [0], [0], [1], [0, 0, 1, 1], [], []>} : vector<8x256xf32>, vector<256x1xf32>, vector<8x1xf32> -> vector<8x1xf32>
    %14 = arith.addf %11, %13 : vector<8x1xf32>
    %c0_12 = arith.constant 0 : index
    %c0_13 = arith.constant 0 : index
    %15 = vector.load %arg7[%c0_12, %c0_13] : memref<8x1xf32, #tpu.memory_space<vmem>>, vector<8x1xf32>
    tpu.vector_store %arg7[%c0_12, %c0_13], %14 {strides = array<i32>} : memref<8x1xf32, #tpu.memory_space<vmem>>, vector<8x1xf32>,
    %c0_i32_14 = arith.constant 0 : i32
    %16 = arith.cmpi eq, %arg1, %c0_i32_14 : i32
    %17 = arith.extui %16 : i1 to i32
    %c0_i32_15 = arith.constant 0 : i32
    %18 = arith.cmpi ne, %17, %c0_i32_15 : i32
    scf.if %18 {
      %c0_16 = arith.constant 0 : index
      %c0_17 = arith.constant 0 : index
      %19 = vector.load %arg7[%c0_16, %c0_17] : memref<8x1xf32, #tpu.memory_space<vmem>>, vector<8x1xf32>
      %20 = tpu.transpose %19, [1, 0] : vector<8x1xf32> -> vector<1x8xf32>
      %21 = vector.shape_cast %20 : vector<1x8xf32> to vector<1x1x8xf32>
      %c0_18 = arith.constant 0 : index
      %c0_19 = arith.constant 0 : index
      %c0_20 = arith.constant 0 : index
      %22 = vector.load %arg6[%c0_18, %c0_19, %c0_20] : memref<1x1x8xf32, #tpu.memory_space<vmem>>, vector<1x1x8xf32>
      tpu.vector_store %arg6[%c0_18, %c0_19, %c0_20], %21 {strides = array<i32>} : memref<1x1x8xf32, #tpu.memory_space<vmem>>, vector<1x1x8xf32>,
    } else {
    }
    return
  }
  func.func @transform_0(%arg0: i32, %arg1: i32) -> (i32, i32) {
    %c0_i32 = arith.constant 0 : i32
    %c0_i32_0 = arith.constant 0 : i32
    return %arg0, %c0_i32 : i32, i32
  }
  func.func @transform_1(%arg0: i32, %arg1: i32) -> (i32, i32) {
    %c0_i32 = arith.constant 0 : i32
    %c0_i32_0 = arith.constant 0 : i32
    return %c0_i32, %arg1 : i32, i32
  }
  func.func @transform_2(%arg0: i32, %arg1: i32) -> (i32, i32) {
    %c0_i32 = arith.constant 0 : i32
    %c0_i32_0 = arith.constant 0 : i32
    return %c0_i32, %arg1 : i32, i32
  }
  func.func @transform_3(%arg0: i32, %arg1: i32) -> (i32, i32) {
    %c0_i32 = arith.constant 0 : i32
    %c0_i32_0 = arith.constant 0 : i32
    return %arg1, %c0_i32 : i32, i32
  }
  func.func @transform_4(%arg0: i32, %arg1: i32) -> (i32, i32, i32) {
    %c0_i32 = arith.constant 0 : i32
    %c0_i32_0 = arith.constant 0 : i32
    %c0_i32_1 = arith.constant 0 : i32
    return %arg0, %c0_i32, %c0_i32_0 : i32, i32, i32
  }
}

module attributes {stable_mosaic.version = 11 : i64} {
  func.func @_cvx_kernel(%arg0: i32, %arg1: i32, %arg2: memref<8x16xf32, #tpu.memory_space<vmem>>, %arg3: memref<16x256xf32, #tpu.memory_space<vmem>>, %arg4: memref<1x256xf32, #tpu.memory_space<vmem>>, %arg5: memref<256x1xf32, #tpu.memory_space<vmem>>, %arg6: memref<8x1xf32, #tpu.memory_space<vmem>>, %arg7: memref<8x1xf32, #tpu.memory_space<vmem>>) attributes {dimension_semantics = [#tpu.dimension_semantics<parallel>, #tpu.dimension_semantics<arbitrary>], iteration_bounds = array<i64: 1, 1>, scalar_prefetch = 0 : i64, scratch_operands = 1 : i64, tpu.core_type = #tpu.core_type<tc>, window_params = [{transform_indices = @transform_0, window_bounds = array<i64: 8, 16>}, {transform_indices = @transform_1, window_bounds = array<i64: 16, 256>}, {transform_indices = @transform_2, window_bounds = array<i64: 1, 256>}, {transform_indices = @transform_3, window_bounds = array<i64: 256, 1>}, {transform_indices = @transform_4, window_bounds = array<i64: 8, 1>}]} {
    %c0_i32 = arith.constant 0 : i32
    %0 = arith.cmpi eq, %arg1, %c0_i32 : i32
    %1 = arith.extui %0 : i1 to i32
    %c0_i32_0 = arith.constant 0 : i32
    %2 = arith.cmpi ne, %1, %c0_i32_0 : i32
    scf.if %2 {
      %cst_16 = arith.constant 0.000000e+00 : f32
      %19 = vector.broadcast %cst_16 : f32 to vector<8x1xf32>
      %c0_17 = arith.constant 0 : index
      %c0_18 = arith.constant 0 : index
      %20 = vector.load %arg7[%c0_17, %c0_18] : memref<8x1xf32, #tpu.memory_space<vmem>>, vector<8x1xf32>
      tpu.vector_store %arg7[%c0_17, %c0_18], %19 {strides = array<i32>} : memref<8x1xf32, #tpu.memory_space<vmem>>, vector<8x1xf32>,
    } else {
    }
    %c0 = arith.constant 0 : index
    %c0_1 = arith.constant 0 : index
    %3 = vector.load %arg2[%c0, %c0_1] : memref<8x16xf32, #tpu.memory_space<vmem>>, vector<8x16xf32>
    %c0_2 = arith.constant 0 : index
    %c0_3 = arith.constant 0 : index
    %4 = vector.load %arg3[%c0_2, %c0_3] : memref<16x256xf32, #tpu.memory_space<vmem>>, vector<16x256xf32>
    %cst = arith.constant dense<0.000000e+00> : vector<8x256xf32>
    %5 = tpu.matmul %3, %4, %cst {dimension_numbers = #tpu.dot_dimension_numbers<[1], [0], [0], [1], [0, 0, 1, 1], [], []>} : vector<8x16xf32>, vector<16x256xf32>, vector<8x256xf32> -> vector<8x256xf32>
    %c0_4 = arith.constant 0 : index
    %c0_5 = arith.constant 0 : index
    %6 = vector.load %arg4[%c0_4, %c0_5] : memref<1x256xf32, #tpu.memory_space<vmem>>, vector<1x256xf32>
    %7 = vector.broadcast %6 : vector<1x256xf32> to vector<8x256xf32>
    %8 = arith.addf %5, %7 : vector<8x256xf32>
    %cst_6 = arith.constant 0.000000e+00 : f32
    %9 = vector.broadcast %cst_6 : f32 to vector<8x256xf32>
    %10 = arith.maximumf %8, %9 : vector<8x256xf32>
    %c0_7 = arith.constant 0 : index
    %c0_8 = arith.constant 0 : index
    %11 = vector.load %arg7[%c0_7, %c0_8] : memref<8x1xf32, #tpu.memory_space<vmem>>, vector<8x1xf32>
    %c0_9 = arith.constant 0 : index
    %c0_10 = arith.constant 0 : index
    %12 = vector.load %arg5[%c0_9, %c0_10] : memref<256x1xf32, #tpu.memory_space<vmem>>, vector<256x1xf32>
    %cst_11 = arith.constant dense<0.000000e+00> : vector<8x1xf32>
    %13 = tpu.matmul %10, %12, %cst_11 {dimension_numbers = #tpu.dot_dimension_numbers<[1], [0], [0], [1], [0, 0, 1, 1], [], []>} : vector<8x256xf32>, vector<256x1xf32>, vector<8x1xf32> -> vector<8x1xf32>
    %14 = arith.addf %11, %13 : vector<8x1xf32>
    %c0_12 = arith.constant 0 : index
    %c0_13 = arith.constant 0 : index
    %15 = vector.load %arg7[%c0_12, %c0_13] : memref<8x1xf32, #tpu.memory_space<vmem>>, vector<8x1xf32>
    tpu.vector_store %arg7[%c0_12, %c0_13], %14 {strides = array<i32>} : memref<8x1xf32, #tpu.memory_space<vmem>>, vector<8x1xf32>,
    %c0_i32_14 = arith.constant 0 : i32
    %16 = arith.cmpi eq, %arg1, %c0_i32_14 : i32
    %17 = arith.extui %16 : i1 to i32
    %c0_i32_15 = arith.constant 0 : i32
    %18 = arith.cmpi ne, %17, %c0_i32_15 : i32
    scf.if %18 {
      %c0_16 = arith.constant 0 : index
      %c0_17 = arith.constant 0 : index
      %19 = vector.load %arg7[%c0_16, %c0_17] : memref<8x1xf32, #tpu.memory_space<vmem>>, vector<8x1xf32>
      %c0_18 = arith.constant 0 : index
      %c0_19 = arith.constant 0 : index
      %20 = vector.load %arg6[%c0_18, %c0_19] : memref<8x1xf32, #tpu.memory_space<vmem>>, vector<8x1xf32>
      tpu.vector_store %arg6[%c0_18, %c0_19], %19 {strides = array<i32>} : memref<8x1xf32, #tpu.memory_space<vmem>>, vector<8x1xf32>,
    } else {
    }
    return
  }
  func.func @transform_0(%arg0: i32, %arg1: i32) -> (i32, i32) {
    %c0_i32 = arith.constant 0 : i32
    %c0_i32_0 = arith.constant 0 : i32
    return %arg0, %c0_i32 : i32, i32
  }
  func.func @transform_1(%arg0: i32, %arg1: i32) -> (i32, i32) {
    %c0_i32 = arith.constant 0 : i32
    %c0_i32_0 = arith.constant 0 : i32
    return %c0_i32, %arg1 : i32, i32
  }
  func.func @transform_2(%arg0: i32, %arg1: i32) -> (i32, i32) {
    %c0_i32 = arith.constant 0 : i32
    %c0_i32_0 = arith.constant 0 : i32
    return %c0_i32, %arg1 : i32, i32
  }
  func.func @transform_3(%arg0: i32, %arg1: i32) -> (i32, i32) {
    %c0_i32 = arith.constant 0 : i32
    %c0_i32_0 = arith.constant 0 : i32
    return %arg1, %c0_i32 : i32, i32
  }
  func.func @transform_4(%arg0: i32, %arg1: i32) -> (i32, i32) {
    %c0_i32 = arith.constant 0 : i32
    %c0_i32_0 = arith.constant 0 : i32
    return %arg0, %c0_i32 : i32, i32
  }
}

</mosaic_0001>

<bundles_post_ra>
// kernel: tpu_custom_call.1
= control target key start
LH: loop header
LB: loop body
LE: loop exit
PB: predicated region body
PF: predicated region fallthrough
CT: control target
= control target key end

     0   :  { %vm22_vm0 = vcmask 7168   ;;  %v374_v5 = vmov 0.0   ;;  %vm41_vm1 = vcmask 130048   ;;  %s529_s0 = inlined_call_operand.vmem [shape: f32[8,16], index: 0, kind: input, shape index: {}]   ;;  %s530_s1 = inlined_call_operand.vmem [shape: f32[16,256], index: 1, kind: input, shape index: {}]   ;;  %s531_s2 = inlined_call_operand.vmem [shape: f32[1,256], index: 2, kind: input, shape index: {}]   ;;  %s532_s3 = inlined_call_operand.vmem [shape: f32[256,1], index: 3, kind: input, shape index: {}]   ;;  %s533_s4 = inlined_call_operand.hbm [shape: f32[1,1,8], index: 4, kind: output, shape index: {}]  }
   0x1   :  { %v26_v0 = vld [vmem:[%s530_s1 + $0x8] sm:$0xff]  ;;  %v28_v1 = vld [vmem:[%s530_s1 + $0x18] sm:$0xff]  ;;  %v25_v2 = vld [vmem:[%s530_s1] sm:$0xff]  ;;  %23 = vst.msk [vmem:[#allocation2] sm:$0xff] %vm22_vm0, %v374_v5  ;;  %109 = vmatprep.mubr.f32.mxu0 %v374_v5 }
   0x2   :  { %v312_v3 = vpack.c.bf16 %v28_v1, %v26_v0  ;;  %v27_v4 = vld [vmem:[%s530_s1 + $0x10] sm:$0xff]  ;;  %v135_v6 = vld [vmem:[%s532_s3 + $0x80] sm:$0xff]  ;;  %v136_v9 = vld [vmem:[%s532_s3 + $0x88] sm:$0xff] }
   0x3   :  { %v314_v7 = vpack.c.bf16 %v27_v4, %v25_v2  ;;  %v24_v8 = vld [vmem:[%s529_s0] sm:$0xff]  ;;  %v120_v11 = vld [vmem:[%s532_s3 + $0x8] sm:$0xff]  ;;  %v316_v12 = vpack.c.bf16 %v136_v9, %v135_v6  ;;  %v137_v14 = vld [vmem:[%s532_s3 + $0x90] sm:$0xff] }
   0x4   :  { %v119_v10 = vld [vmem:[%s532_s3] sm:$0xff]  ;;  %313 = vmatprep.subr.bf16.mxu0 %v312_v3  ;;  %v138_v15 = vld [vmem:[%s532_s3 + $0x98] sm:$0xff]  ;;  %v121_v16 = vld [vmem:[%s532_s3 + $0x10] sm:$0xff] }
   0x5   :  { %v318_v13 = vpack.c.bf16 %v120_v11, %v119_v10  ;;  %315 = vmatpush1.bf16.msra.mxu0 %v314_v7  ;;  %v320_v17 = vpack.c.bf16 %v138_v15, %v137_v14  ;;  %v122_v18 = vld [vmem:[%s532_s3 + $0x18] sm:$0xff]  ;;  %v139_v19 = vld [vmem:[%s532_s3 + $0xa0] sm:$0xff]  ;;  %v140_v20 = vld [vmem:[%s532_s3 + $0xa8] sm:$0xff]  ;;  %317 = vmatprep.subr.bf16.mxu1 %v316_v12 }
   0x6   :  { %v322_v21 = vpack.c.bf16 %v122_v18, %v121_v16  ;;  %v324_v22 = vpack.c.bf16 %v140_v20, %v139_v19  ;;  %v123_v23 = vld [vmem:[%s532_s3 + $0x20] sm:$0xff]  ;;  %v124_v24 = vld [vmem:[%s532_s3 + $0x28] sm:$0xff]  ;;  %v141_v25 = vld [vmem:[%s532_s3 + $0xb0] sm:$0xff] }
   0x7   :  { %319 = vmatpush3.bf16.msra.mxu1 %v318_v13  ;;  %v142_v26 = vld [vmem:[%s532_s3 + $0xb8] sm:$0xff]  ;;  %v326_v27 = vpack.c.bf16 %v124_v24, %v123_v23 }
   0x8   :  { %276 = vmatmul.mubr.msk.f32.vlgmr.msra.gmra.mrb[0].mxu0 %vm41_vm1, %v24_v8  ;;  %321 = vmatprep.subr.bf16.mxu1 %v320_v17 }
   0xb   :  { %323 = vmatpush3.bf16.msra.mxu1 %v322_v21 }
   0xc   :  { %9 = vsyncpa [#allocation4], 0  ;;  %325 = vmatprep.subr.bf16.mxu1 %v324_v22  ;;  %v328_v28 = vpack.c.bf16 %v142_v26, %v141_v25  ;;  %v125_v29 = vld [vmem:[%s532_s3 + $0x30] sm:$0xff]  ;;  %v126_v30 = vld [vmem:[%s532_s3 + $0x38] sm:$0xff]  ;;  %v31_v56 = vlaneseq  ;;  %vm260_vm2 = vcmask 57344  }
   0xd   :  { %v143_v31 = vld [vmem:[%s532_s3 + $0xc0] sm:$0xff]  ;;  %v144_v32 = vld [vmem:[%s532_s3 + $0xc8] sm:$0xff]  ;;  %v330_v33 = vpack.c.bf16 %v126_v30, %v125_v29  ;;  %v145_v37 = vld [vmem:[%s532_s3 + $0xd0] sm:$0xff] }
   0xe   :  { %v332_v34 = vpack.c.bf16 %v144_v32, %v143_v31  ;;  %v127_v35 = vld [vmem:[%s532_s3 + $0x40] sm:$0xff]  ;;  %v128_v36 = vld [vmem:[%s532_s3 + $0x48] sm:$0xff]  ;;  %v146_v38 = vld [vmem:[%s532_s3 + $0xd8] sm:$0xff]  ;;  %v32_v57 = vshrl.u32 %v31_v56, 7 }
   0xf   :  { %327 = vmatpush3.bf16.msra.mxu1 %v326_v27  ;;  %v334_v39 = vpack.c.bf16 %v128_v36, %v127_v35  ;;  %v336_v40 = vpack.c.bf16 %v146_v38, %v145_v37  ;;  %v129_v41 = vld [vmem:[%s532_s3 + $0x50] sm:$0xff]  ;;  %v130_v42 = vld [vmem:[%s532_s3 + $0x58] sm:$0xff]  ;;  %v147_v43 = vld [vmem:[%s532_s3 + $0xe0] sm:$0xff] }
  0x10   :  { %329 = vmatprep.subr.bf16.mxu1 %v328_v28  ;;  %v148_v44 = vld [vmem:[%s532_s3 + $0xe8] sm:$0xff]  ;;  %v338_v45 = vpack.c.bf16 %v130_v42, %v129_v41  ;;  %v131_v47 = vld [vmem:[%s532_s3 + $0x60] sm:$0xff]  ;;  %v149_v50 = vld [vmem:[%s532_s3 + $0xf0] sm:$0xff]  ;;  %v33_v58 = vsub.s32 0, %v32_v57  ;;  %v37_v60 = vsub.s32 1, %v32_v57 }
  0x11   :  { %v340_v46 = vpack.c.bf16 %v148_v44, %v147_v43  ;;  %v132_v48 = vld [vmem:[%s532_s3 + $0x68] sm:$0xff]  ;;  %v150_v51 = vld [vmem:[%s532_s3 + $0xf8] sm:$0xff]  ;;  %v133_v53 = vld [vmem:[%s532_s3 + $0x70] sm:$0xff] }
  0x12   :  { %v342_v49 = vpack.c.bf16 %v132_v48, %v131_v47  ;;  %v344_v52 = vpack.c.bf16 %v150_v51, %v149_v50  ;;  %v134_v54 = vld [vmem:[%s532_s3 + $0x78] sm:$0xff]  ;;  %v29_v59 = vld [vmem:[%s531_s2] sm:$0x3]  ;;  %s375_s2 = smov [#allocation3]  }
  0x13   :  { %331 = vmatpush3.bf16.msra.mxu1 %v330_v33  ;;  %v346_v55 = vpack.c.bf16 %v134_v54, %v133_v53  ;;  %v34_v61 = vrot.slane %v29_v59, %v33_v58  ;;  %v38_v62 = vrot.slane %v29_v59, %v37_v60  ;;  %v118_v6 = vld [vmem:[#allocation2] sm:$0xff]  ;;  %s268_s3 = sshll.u32 %s375_s2, 4  ;;  %s269_s3 = int_to_ptr.vmem [resolvable:$true] %s268_s3 }
  0x14   :  { %333 = vmatprep.subr.bf16.mxu1 %v332_v34  ;;  %s350_s0 = scalar_lea.vmem %s269_s3, 16  ;;  %s354_s8 = scalar_lea.vmem %s269_s3, 32 }
  0x15   :  { %p351_p0 = scmp.ne.s32.totalorder %s269_s3, %s350_s0  ;;  %p355_p1 = scmp.lt.s32.totalorder %s269_s3, %s269_s3 }
  0x16   :  { %p356_p2 = scmp.lt.s32.totalorder %s354_s8, %s350_s0 }
  0x17   :  { %335 = vmatpush3.bf16.msra.mxu1 %v334_v39 }
  0x18   :  { %337 = vmatprep.subr.bf16.mxu1 %v336_v40  ;;  %p357_p3 = por %p356_p2, %p355_p1 }
  0x1a   :  { %p358_p4 = pnand %p357_p3, %p351_p0 }
  0x1b   :  { %339 = vmatpush3.bf16.msra.mxu1 %v338_v45 }
  0x1c   :  { %341 = vmatprep.subr.bf16.mxu1 %v340_v46 }
  0x1f   :  { %343 = vmatpush3.bf16.msra.mxu1 %v342_v49 }
  0x20   :  { %345 = vmatprep.subr.bf16.mxu1 %v344_v52 }
  0x23   :  { %347 = vmatpush3.bf16.msra.mxu1 %v346_v55 }
  0xdb   :  { %v111_v63 = vpop.f32.mrb[0].mxu0 }
  0xdc   :  { %v112_v0 = vadd.f32 %v111_v63, %v34_v61  ;;  %v113_v1 = vpop.f32.mrb[1].mxu0 }
  0xdd   :  { %v114_v2 = vadd.f32 %v113_v1, %v38_v62 }
  0xde   :  { %v116_v4 = vmax.f32 %v112_v0, 0.0 }
  0xdf   :  { %v117_v3 = vmax.f32 %v114_v2, 0.0 }
  0xe1   :  { %215 = vmatprep.mubr.f32.mxu1 %v117_v3 }
  0xe2   :  { %216 = vmatmul.mubr.f32.vlgmr.msra.gmra.mrb[0].mxu1 %v116_v4 }
 0x1b5   :  { %v309_v5 = vpop.f32.mrb[0].mxu1 }
 0x1b6   :  { %v310_v7 = vpop.f32.mrb[1].mxu1 }
 0x1b7   :  { %v311_v8 = vadd.f32 %v310_v7, %v309_v5 }
 0x1b9   :  { %v221_v9 = vadd.f32 %v311_v8, %v118_v6 }
 0x1bb   :  { %223 = vst.msk [vmem:[#allocation2] sm:$0xff] %vm22_vm0, %v221_v9 }
 0x1c2   :  { %v227_v10 = vld [vmem:[#allocation2] sm:$0xff] }
 0x1c3   :  { %228 = vxpose.xlu0.b32.start.end [1/1] (short) (narrow) %v227_v10, 8 }
 0x243   :  { %v244_v11 = vpop.trf.xlu0 }
 0x244   :  { %261 = vst.msk [vmem:[#allocation3] sm:$0x1] %vm260_vm2, %v244_v11 }
 0x245   :  { %361 = shalt.err (!%p358_p4)
}
 0x246   :  { %s362_s11 = scalar_lea.hbm %s533_s4, 16 }
 0x247   :  { %p363_p5 = scmp.ne.s32.totalorder %s533_s4, %s362_s11  ;;  %p366_p6 = scmp.lt.u32.totalorder %s362_s11, %s533_s4 }
 0x249   :  { %p368_p7 = pnand %p366_p6, %p363_p5 }
 0x24b   :  { %371 = shalt.err (!%p368_p7)
}
 0x24c   :  { %271 = dma.vmem_to_hbm [thread:$0]  %s269_s3, 16, %s533_s4, [#allocation4]  }
 0x24d   :  { %372 = dma.done.wait [#allocation4], 16  }
 0x24e   :  { %373 = vsyncadd [#allocation4], 4294967280 }
 0x24f   :  { %275 = vsyncpa [#allocation4], 1 }

// kernel: tpu_custom_call.1
= control target key start
LH: loop header
LB: loop body
LE: loop exit
PB: predicated region body
PF: predicated region fallthrough
CT: control target
= control target key end

     0   :  { %vm22_vm0 = vcmask 7168   ;;  %v374_v5 = vmov 0.0   ;;  %vm41_vm1 = vcmask 130048   ;;  %s529_s0 = inlined_call_operand.vmem [shape: f32[8,16], index: 0, kind: input, shape index: {}]   ;;  %s530_s1 = inlined_call_operand.vmem [shape: f32[16,256], index: 1, kind: input, shape index: {}]   ;;  %s531_s2 = inlined_call_operand.vmem [shape: f32[1,256], index: 2, kind: input, shape index: {}]   ;;  %s532_s3 = inlined_call_operand.vmem [shape: f32[256,1], index: 3, kind: input, shape index: {}]   ;;  %s533_s4 = inlined_call_operand.hbm [shape: f32[1,1,8], index: 4, kind: output, shape index: {}]  }
   0x1   :  { %v26_v0 = vld [vmem:[%s530_s1 + $0x8] sm:$0xff]  ;;  %v28_v1 = vld [vmem:[%s530_s1 + $0x18] sm:$0xff]  ;;  %v25_v2 = vld [vmem:[%s530_s1] sm:$0xff]  ;;  %23 = vst.msk [vmem:[#allocation2] sm:$0xff] %vm22_vm0, %v374_v5  ;;  %109 = vmatprep.mubr.f32.mxu0 %v374_v5 }
   0x2   :  { %v312_v3 = vpack.c.bf16 %v28_v1, %v26_v0  ;;  %v27_v4 = vld [vmem:[%s530_s1 + $0x10] sm:$0xff]  ;;  %v135_v6 = vld [vmem:[%s532_s3 + $0x80] sm:$0xff]  ;;  %v136_v9 = vld [vmem:[%s532_s3 + $0x88] sm:$0xff] }
   0x3   :  { %v314_v7 = vpack.c.bf16 %v27_v4, %v25_v2  ;;  %v24_v8 = vld [vmem:[%s529_s0] sm:$0xff]  ;;  %v120_v11 = vld [vmem:[%s532_s3 + $0x8] sm:$0xff]  ;;  %v316_v12 = vpack.c.bf16 %v136_v9, %v135_v6  ;;  %v137_v14 = vld [vmem:[%s532_s3 + $0x90] sm:$0xff] }
   0x4   :  { %v119_v10 = vld [vmem:[%s532_s3] sm:$0xff]  ;;  %313 = vmatprep.subr.bf16.mxu0 %v312_v3  ;;  %v138_v15 = vld [vmem:[%s532_s3 + $0x98] sm:$0xff]  ;;  %v121_v16 = vld [vmem:[%s532_s3 + $0x10] sm:$0xff] }
   0x5   :  { %v318_v13 = vpack.c.bf16 %v120_v11, %v119_v10  ;;  %315 = vmatpush1.bf16.msra.mxu0 %v314_v7  ;;  %v320_v17 = vpack.c.bf16 %v138_v15, %v137_v14  ;;  %v122_v18 = vld [vmem:[%s532_s3 + $0x18] sm:$0xff]  ;;  %v139_v19 = vld [vmem:[%s532_s3 + $0xa0] sm:$0xff]  ;;  %v140_v20 = vld [vmem:[%s532_s3 + $0xa8] sm:$0xff]  ;;  %317 = vmatprep.subr.bf16.mxu1 %v316_v12 }
   0x6   :  { %v322_v21 = vpack.c.bf16 %v122_v18, %v121_v16  ;;  %v324_v22 = vpack.c.bf16 %v140_v20, %v139_v19  ;;  %v123_v23 = vld [vmem:[%s532_s3 + $0x20] sm:$0xff]  ;;  %v124_v24 = vld [vmem:[%s532_s3 + $0x28] sm:$0xff]  ;;  %v141_v25 = vld [vmem:[%s532_s3 + $0xb0] sm:$0xff] }
   0x7   :  { %319 = vmatpush3.bf16.msra.mxu1 %v318_v13  ;;  %v142_v26 = vld [vmem:[%s532_s3 + $0xb8] sm:$0xff]  ;;  %v326_v27 = vpack.c.bf16 %v124_v24, %v123_v23 }
   0x8   :  { %276 = vmatmul.mubr.msk.f32.vlgmr.msra.gmra.mrb[0].mxu0 %vm41_vm1, %v24_v8  ;;  %321 = vmatprep.subr.bf16.mxu1 %v320_v17 }
   0xb   :  { %323 = vmatpush3.bf16.msra.mxu1 %v322_v21 }
   0xc   :  { %9 = vsyncpa [#allocation4], 0  ;;  %325 = vmatprep.subr.bf16.mxu1 %v324_v22  ;;  %v328_v28 = vpack.c.bf16 %v142_v26, %v141_v25  ;;  %v125_v29 = vld [vmem:[%s532_s3 + $0x30] sm:$0xff]  ;;  %v126_v30 = vld [vmem:[%s532_s3 + $0x38] sm:$0xff]  ;;  %v31_v56 = vlaneseq  ;;  %vm260_vm2 = vcmask 57344  }
   0xd   :  { %v143_v31 = vld [vmem:[%s532_s3 + $0xc0] sm:$0xff]  ;;  %v144_v32 = vld [vmem:[%s532_s3 + $0xc8] sm:$0xff]  ;;  %v330_v33 = vpack.c.bf16 %v126_v30, %v125_v29  ;;  %v145_v37 = vld [vmem:[%s532_s3 + $0xd0] sm:$0xff] }
   0xe   :  { %v332_v34 = vpack.c.bf16 %v144_v32, %v143_v31  ;;  %v127_v35 = vld [vmem:[%s532_s3 + $0x40] sm:$0xff]  ;;  %v128_v36 = vld [vmem:[%s532_s3 + $0x48] sm:$0xff]  ;;  %v146_v38 = vld [vmem:[%s532_s3 + $0xd8] sm:$0xff]  ;;  %v32_v57 = vshrl.u32 %v31_v56, 7 }
   0xf   :  { %327 = vmatpush3.bf16.msra.mxu1 %v326_v27  ;;  %v334_v39 = vpack.c.bf16 %v128_v36, %v127_v35  ;;  %v336_v40 = vpack.c.bf16 %v146_v38, %v145_v37  ;;  %v129_v41 = vld [vmem:[%s532_s3 + $0x50] sm:$0xff]  ;;  %v130_v42 = vld [vmem:[%s532_s3 + $0x58] sm:$0xff]  ;;  %v147_v43 = vld [vmem:[%s532_s3 + $0xe0] sm:$0xff] }
  0x10   :  { %329 = vmatprep.subr.bf16.mxu1 %v328_v28  ;;  %v148_v44 = vld [vmem:[%s532_s3 + $0xe8] sm:$0xff]  ;;  %v338_v45 = vpack.c.bf16 %v130_v42, %v129_v41  ;;  %v131_v47 = vld [vmem:[%s532_s3 + $0x60] sm:$0xff]  ;;  %v149_v50 = vld [vmem:[%s532_s3 + $0xf0] sm:$0xff]  ;;  %v33_v58 = vsub.s32 0, %v32_v57  ;;  %v37_v60 = vsub.s32 1, %v32_v57 }
  0x11   :  { %v340_v46 = vpack.c.bf16 %v148_v44, %v147_v43  ;;  %v132_v48 = vld [vmem:[%s532_s3 + $0x68] sm:$0xff]  ;;  %v150_v51 = vld [vmem:[%s532_s3 + $0xf8] sm:$0xff]  ;;  %v133_v53 = vld [vmem:[%s532_s3 + $0x70] sm:$0xff] }
  0x12   :  { %v342_v49 = vpack.c.bf16 %v132_v48, %v131_v47  ;;  %v344_v52 = vpack.c.bf16 %v150_v51, %v149_v50  ;;  %v134_v54 = vld [vmem:[%s532_s3 + $0x78] sm:$0xff]  ;;  %v29_v59 = vld [vmem:[%s531_s2] sm:$0x3]  ;;  %s375_s2 = smov [#allocation3]  }
  0x13   :  { %331 = vmatpush3.bf16.msra.mxu1 %v330_v33  ;;  %v346_v55 = vpack.c.bf16 %v134_v54, %v133_v53  ;;  %v34_v61 = vrot.slane %v29_v59, %v33_v58  ;;  %v38_v62 = vrot.slane %v29_v59, %v37_v60  ;;  %v118_v6 = vld [vmem:[#allocation2] sm:$0xff]  ;;  %s268_s3 = sshll.u32 %s375_s2, 4  ;;  %s269_s3 = int_to_ptr.vmem [resolvable:$true] %s268_s3 }
  0x14   :  { %333 = vmatprep.subr.bf16.mxu1 %v332_v34  ;;  %s350_s0 = scalar_lea.vmem %s269_s3, 16  ;;  %s354_s8 = scalar_lea.vmem %s269_s3, 32 }
  0x15   :  { %p351_p0 = scmp.ne.s32.totalorder %s269_s3, %s350_s0  ;;  %p355_p1 = scmp.lt.s32.totalorder %s269_s3, %s269_s3 }
  0x16   :  { %p356_p2 = scmp.lt.s32.totalorder %s354_s8, %s350_s0 }
  0x17   :  { %335 = vmatpush3.bf16.msra.mxu1 %v334_v39 }
  0x18   :  { %337 = vmatprep.subr.bf16.mxu1 %v336_v40  ;;  %p357_p3 = por %p356_p2, %p355_p1 }
  0x1a   :  { %p358_p4 = pnand %p357_p3, %p351_p0 }
  0x1b   :  { %339 = vmatpush3.bf16.msra.mxu1 %v338_v45 }
  0x1c   :  { %341 = vmatprep.subr.bf16.mxu1 %v340_v46 }
  0x1f   :  { %343 = vmatpush3.bf16.msra.mxu1 %v342_v49 }
  0x20   :  { %345 = vmatprep.subr.bf16.mxu1 %v344_v52 }
  0x23   :  { %347 = vmatpush3.bf16.msra.mxu1 %v346_v55 }
  0xdb   :  { %v111_v63 = vpop.f32.mrb[0].mxu0 }
  0xdc   :  { %v112_v0 = vadd.f32 %v111_v63, %v34_v61  ;;  %v113_v1 = vpop.f32.mrb[1].mxu0 }
  0xdd   :  { %v114_v2 = vadd.f32 %v113_v1, %v38_v62 }
  0xde   :  { %v116_v4 = vmax.f32 %v112_v0, 0.0 }
  0xdf   :  { %v117_v3 = vmax.f32 %v114_v2, 0.0 }
  0xe1   :  { %215 = vmatprep.mubr.f32.mxu1 %v117_v3 }
  0xe2   :  { %216 = vmatmul.mubr.f32.vlgmr.msra.gmra.mrb[0].mxu1 %v116_v4 }
 0x1b5   :  { %v309_v5 = vpop.f32.mrb[0].mxu1 }
 0x1b6   :  { %v310_v7 = vpop.f32.mrb[1].mxu1 }
 0x1b7   :  { %v311_v8 = vadd.f32 %v310_v7, %v309_v5 }
 0x1b9   :  { %v221_v9 = vadd.f32 %v311_v8, %v118_v6 }
 0x1bb   :  { %223 = vst.msk [vmem:[#allocation2] sm:$0xff] %vm22_vm0, %v221_v9 }
 0x1c2   :  { %v227_v10 = vld [vmem:[#allocation2] sm:$0xff] }
 0x1c3   :  { %228 = vxpose.xlu0.b32.start.end [1/1] (short) (narrow) %v227_v10, 8 }
 0x243   :  { %v244_v11 = vpop.trf.xlu0 }
 0x244   :  { %261 = vst.msk [vmem:[#allocation3] sm:$0x1] %vm260_vm2, %v244_v11 }
 0x245   :  { %361 = shalt.err (!%p358_p4)
}
 0x246   :  { %s362_s11 = scalar_lea.hbm %s533_s4, 16 }
 0x247   :  { %p363_p5 = scmp.ne.s32.totalorder %s533_s4, %s362_s11  ;;  %p366_p6 = scmp.lt.u32.totalorder %s362_s11, %s533_s4 }
 0x249   :  { %p368_p7 = pnand %p366_p6, %p363_p5 }
 0x24b   :  { %371 = shalt.err (!%p368_p7)
}
 0x24c   :  { %271 = dma.vmem_to_hbm [thread:$0]  %s269_s3, 16, %s533_s4, [#allocation4]  }
 0x24d   :  { %372 = dma.done.wait [#allocation4], 16  }
 0x24e   :  { %373 = vsyncadd [#allocation4], 4294967280 }
 0x24f   :  { %275 = vsyncpa [#allocation4], 1 }

// kernel: tpu_custom_call.1
= control target key start
LH: loop header
LB: loop body
LE: loop exit
PB: predicated region body
PF: predicated region fallthrough
CT: control target
= control target key end

     0   :  { %vm21_vm0 = vcmask 7168   ;;  %v305_v3 = vmov 0.0   ;;  %vm40_vm1 = vcmask 130048   ;;  %v30_v56 = vlaneseq  ;;  %s451_s1 = inlined_call_operand.vmem [shape: f32[16,256], index: 1, kind: input, shape index: {}]   ;;  %s452_s0 = inlined_call_operand.vmem [shape: f32[8,16], index: 0, kind: input, shape index: {}]   ;;  %s453_s3 = inlined_call_operand.vmem [shape: f32[256,1], index: 3, kind: input, shape index: {}]   ;;  %s454_s2 = inlined_call_operand.vmem [shape: f32[1,256], index: 2, kind: input, shape index: {}]   ;;  %s455_s4 = inlined_call_operand.vmem [shape: f32[8,1], index: 4, kind: output, shape index: {}]  }
   0x1   :  { %v25_v0 = vld [vmem:[%s451_s1 + $0x8] sm:$0xff]  ;;  %v27_v1 = vld [vmem:[%s451_s1 + $0x18] sm:$0xff]  ;;  %v24_v2 = vld [vmem:[%s451_s1] sm:$0xff]  ;;  %22 = vst.msk [vmem:[#allocation2] sm:$0xff] %vm21_vm0, %v305_v3  ;;  %108 = vmatprep.mubr.f32.mxu0 %v305_v3 }
   0x2   :  { %v268_v4 = vpack.c.bf16 %v27_v1, %v25_v0  ;;  %v26_v5 = vld [vmem:[%s451_s1 + $0x10] sm:$0xff]  ;;  %v134_v6 = vld [vmem:[%s453_s3 + $0x80] sm:$0xff]  ;;  %v135_v9 = vld [vmem:[%s453_s3 + $0x88] sm:$0xff]  ;;  %v31_v57 = vshrl.u32 %v30_v56, 7 }
   0x3   :  { %v270_v7 = vpack.c.bf16 %v26_v5, %v24_v2  ;;  %v23_v8 = vld [vmem:[%s452_s0] sm:$0xff]  ;;  %v119_v11 = vld [vmem:[%s453_s3 + $0x8] sm:$0xff]  ;;  %v272_v12 = vpack.c.bf16 %v135_v9, %v134_v6  ;;  %v136_v14 = vld [vmem:[%s453_s3 + $0x90] sm:$0xff] }
   0x4   :  { %v118_v10 = vld [vmem:[%s453_s3] sm:$0xff]  ;;  %269 = vmatprep.subr.bf16.mxu0 %v268_v4  ;;  %v137_v15 = vld [vmem:[%s453_s3 + $0x98] sm:$0xff]  ;;  %v120_v16 = vld [vmem:[%s453_s3 + $0x10] sm:$0xff]  ;;  %v32_v58 = vsub.s32 0, %v31_v57  ;;  %v36_v60 = vsub.s32 1, %v31_v57 }
   0x5   :  { %v274_v13 = vpack.c.bf16 %v119_v11, %v118_v10  ;;  %271 = vmatpush1.bf16.msra.mxu0 %v270_v7  ;;  %v276_v17 = vpack.c.bf16 %v137_v15, %v136_v14  ;;  %v121_v18 = vld [vmem:[%s453_s3 + $0x18] sm:$0xff]  ;;  %v138_v19 = vld [vmem:[%s453_s3 + $0xa0] sm:$0xff]  ;;  %v139_v20 = vld [vmem:[%s453_s3 + $0xa8] sm:$0xff]  ;;  %273 = vmatprep.subr.bf16.mxu1 %v272_v12 }
   0x6   :  { %v278_v21 = vpack.c.bf16 %v121_v18, %v120_v16  ;;  %v280_v22 = vpack.c.bf16 %v139_v20, %v138_v19  ;;  %v122_v23 = vld [vmem:[%s453_s3 + $0x20] sm:$0xff]  ;;  %v123_v24 = vld [vmem:[%s453_s3 + $0x28] sm:$0xff]  ;;  %v140_v25 = vld [vmem:[%s453_s3 + $0xb0] sm:$0xff] }
   0x7   :  { %275 = vmatpush3.bf16.msra.mxu1 %v274_v13  ;;  %v141_v26 = vld [vmem:[%s453_s3 + $0xb8] sm:$0xff]  ;;  %v282_v27 = vpack.c.bf16 %v123_v24, %v122_v23  ;;  %v124_v29 = vld [vmem:[%s453_s3 + $0x30] sm:$0xff]  ;;  %v142_v31 = vld [vmem:[%s453_s3 + $0xc0] sm:$0xff] }
   0x8   :  { %232 = vmatmul.mubr.msk.f32.vlgmr.msra.gmra.mrb[0].mxu0 %vm40_vm1, %v23_v8  ;;  %277 = vmatprep.subr.bf16.mxu1 %v276_v17  ;;  %v284_v28 = vpack.c.bf16 %v141_v26, %v140_v25  ;;  %v125_v30 = vld [vmem:[%s453_s3 + $0x38] sm:$0xff]  ;;  %v143_v32 = vld [vmem:[%s453_s3 + $0xc8] sm:$0xff]  ;;  %v126_v35 = vld [vmem:[%s453_s3 + $0x40] sm:$0xff] }
   0x9   :  { %v286_v33 = vpack.c.bf16 %v125_v30, %v124_v29  ;;  %v288_v34 = vpack.c.bf16 %v143_v32, %v142_v31  ;;  %v127_v36 = vld [vmem:[%s453_s3 + $0x48] sm:$0xff]  ;;  %v144_v37 = vld [vmem:[%s453_s3 + $0xd0] sm:$0xff]  ;;  %v145_v38 = vld [vmem:[%s453_s3 + $0xd8] sm:$0xff] }
   0xa   :  { %v290_v39 = vpack.c.bf16 %v127_v36, %v126_v35  ;;  %v292_v40 = vpack.c.bf16 %v145_v38, %v144_v37  ;;  %v128_v41 = vld [vmem:[%s453_s3 + $0x50] sm:$0xff]  ;;  %v129_v42 = vld [vmem:[%s453_s3 + $0x58] sm:$0xff]  ;;  %v146_v43 = vld [vmem:[%s453_s3 + $0xe0] sm:$0xff] }
   0xb   :  { %279 = vmatpush3.bf16.msra.mxu1 %v278_v21  ;;  %v147_v44 = vld [vmem:[%s453_s3 + $0xe8] sm:$0xff]  ;;  %v294_v45 = vpack.c.bf16 %v129_v42, %v128_v41  ;;  %v130_v47 = vld [vmem:[%s453_s3 + $0x60] sm:$0xff]  ;;  %v148_v50 = vld [vmem:[%s453_s3 + $0xf0] sm:$0xff] }
   0xc   :  { %281 = vmatprep.subr.bf16.mxu1 %v280_v22  ;;  %v296_v46 = vpack.c.bf16 %v147_v44, %v146_v43  ;;  %v131_v48 = vld [vmem:[%s453_s3 + $0x68] sm:$0xff]  ;;  %v149_v51 = vld [vmem:[%s453_s3 + $0xf8] sm:$0xff]  ;;  %v132_v53 = vld [vmem:[%s453_s3 + $0x70] sm:$0xff] }
   0xd   :  { %v298_v49 = vpack.c.bf16 %v131_v48, %v130_v47  ;;  %v300_v52 = vpack.c.bf16 %v149_v51, %v148_v50  ;;  %v133_v54 = vld [vmem:[%s453_s3 + $0x78] sm:$0xff]  ;;  %v28_v59 = vld [vmem:[%s454_s2] sm:$0x3] }
   0xe   :  { %v302_v55 = vpack.c.bf16 %v133_v54, %v132_v53  ;;  %v33_v61 = vrot.slane %v28_v59, %v32_v58  ;;  %v37_v62 = vrot.slane %v28_v59, %v36_v60  ;;  %v117_v6 = vld [vmem:[#allocation2] sm:$0xff] }
   0xf   :  { %283 = vmatpush3.bf16.msra.mxu1 %v282_v27 }
  0x10   :  { %285 = vmatprep.subr.bf16.mxu1 %v284_v28 }
  0x13   :  { %287 = vmatpush3.bf16.msra.mxu1 %v286_v33 }
  0x14   :  { %289 = vmatprep.subr.bf16.mxu1 %v288_v34 }
  0x17   :  { %291 = vmatpush3.bf16.msra.mxu1 %v290_v39 }
  0x18   :  { %293 = vmatprep.subr.bf16.mxu1 %v292_v40 }
  0x1b   :  { %295 = vmatpush3.bf16.msra.mxu1 %v294_v45 }
  0x1c   :  { %297 = vmatprep.subr.bf16.mxu1 %v296_v46 }
  0x1f   :  { %299 = vmatpush3.bf16.msra.mxu1 %v298_v49 }
  0x20   :  { %301 = vmatprep.subr.bf16.mxu1 %v300_v52 }
  0x23   :  { %303 = vmatpush3.bf16.msra.mxu1 %v302_v55 }
  0xdb   :  { %v110_v63 = vpop.f32.mrb[0].mxu0 }
  0xdc   :  { %v111_v0 = vadd.f32 %v110_v63, %v33_v61  ;;  %v112_v1 = vpop.f32.mrb[1].mxu0 }
  0xdd   :  { %v113_v2 = vadd.f32 %v112_v1, %v37_v62 }
  0xde   :  { %v115_v4 = vmax.f32 %v111_v0, 0.0 }
  0xdf   :  { %v116_v3 = vmax.f32 %v113_v2, 0.0 }
  0xe1   :  { %214 = vmatprep.mubr.f32.mxu1 %v116_v3 }
  0xe2   :  { %215 = vmatmul.mubr.f32.vlgmr.msra.gmra.mrb[0].mxu1 %v115_v4 }
 0x1b5   :  { %v265_v5 = vpop.f32.mrb[0].mxu1 }
 0x1b6   :  { %v266_v7 = vpop.f32.mrb[1].mxu1 }
 0x1b7   :  { %v267_v8 = vadd.f32 %v266_v7, %v265_v5 }
 0x1b9   :  { %v220_v9 = vadd.f32 %v267_v8, %v117_v6 }
 0x1bb   :  { %222 = vst.msk [vmem:[#allocation2] sm:$0xff] %vm21_vm0, %v220_v9 }
 0x1c2   :  { %v226_v10 = vld [vmem:[#allocation2] sm:$0xff] }
 0x1c3   :  { %227 = vst.msk [vmem:[%s455_s4] sm:$0xff] %vm21_vm0, %v226_v10 }

</bundles_post_ra>
